<compile_context>
chip_gen: v7x
topology: tpu7x:2x2x1
jax: 0.10.0
libtpu: 0.0.40
codegen_flags: <defaults>
</compile_context>

<pallas_src>
import jax
import jax.numpy as jnp
from jax.experimental import pallas as pl
from jax.experimental.pallas import tpu as pltpu

_LANES = 128


def _cdiv(a, b):
    return -(-a // b)


def _round_up(n, m):
    return _cdiv(n, m) * m


def _next_pow2(n):
    if n <= 1:
        return 1
    return 1 << (n - 1).bit_length()


def _mlp_slab_kernel(x_ref, w1_ref, b1_ref, w2_ref, b2_ref, y_ref):
    """One row tile, everything in lane-dense slab layout.

    x_ref : (r_slab, 128)    32 input rows (4 features each) per slab row
    w1_ref: (128, 1024)      kron(I_32, W1.T)  (block-diagonal, resident)
    b1_ref: (1, 1024)        b1 tiled 32x
    w2_ref: (1024, 128)      kron(I_32, W2.T)  (block-diagonal, resident)
    b2_ref: (1, 128)         b2 tiled 32x
    y_ref : (r_slab, 128)    output, identical slab layout to x
    """
    h = jnp.dot(x_ref[...], w1_ref[...], preferred_element_type=jnp.float32)
    h = jnp.tanh(h + b1_ref[...])
    y = jnp.dot(h, w2_ref[...], preferred_element_type=jnp.float32)
    y_ref[...] = (y + b2_ref[...]).astype(y_ref.dtype)


def mlp_forward(x, w1, b1, w2, b2, *, max_row_tile=16384, min_rows_for_split=4096):
    """Forward of MLP(in_f, out_f, width, n_hidden_layers=1, 'tanh', bias=True).

    x : (..., in_features)
    w1: (width, in_features)   b1: (width,)       (PyTorch nn.Linear layout)
    w2: (out_features, width)  b2: (out_features,)
    Returns an array with x's shape (PyTorch: y.view(x.shape), which requires
    out_features == in_features).
    """
    orig_shape = x.shape
    in_f = orig_shape[-1]
    width, in_f_w = w1.shape
    out_f, width_w = w2.shape
    assert in_f_w == in_f and width_w == width, "weight shapes inconsistent with x"
    assert out_f == in_f, "y.view(x.shape) requires out_features == in_features"
    assert _LANES % in_f == 0, "slab packing requires in_features to divide 128"

    rpr = _LANES // in_f                 # input rows packed per 128-lane slab row (32)
    hid_lanes = rpr * width              # hidden slab width (1024 for width=32)
    granule = 8 * rpr                    # 256 rows: keeps slab blocks (8,128)-aligned

    rows = 1
    for d in orig_shape[:-1]:
        rows *= d

    # ---- row-tile / padding selection ------------------------------------------
    if rows > min_rows_for_split:
        n_tiles = max(2, _cdiv(rows, max_row_tile))   # >= 2 tiles: feed both v7x TCs
        if n_tiles % 2:
            n_tiles += 1                              # even split across the 2 cores
        r_tile = _round_up(_cdiv(rows, n_tiles), granule)   # pad bounded by 256*n_tiles
    else:
        n_tiles = 1                                   # single step: no pipeline overhead
        r_tile = granule * _next_pow2(_cdiv(rows, granule))  # bucket small shapes (pow2)
    padded_rows = n_tiles * r_tile

    # ---- free relayout to the lane-dense slab (no transpose, no extra HBM pass) --
    x_flat = x.reshape(-1)                            # contiguous: metadata-only reshape
    pad_elems = (padded_rows - rows) * in_f
    if pad_elems:
        x_flat = jnp.pad(x_flat, (0, pad_elems))      # zero fill (finite by construction)
    x_slab = x_flat.reshape(padded_rows // rpr, _LANES)

    # ---- fold the tiny per-row linears into block-diagonal lane-dense weights ----
    f32 = jnp.float32
    eye = jnp.eye(rpr, dtype=f32)
    w1_bd = jnp.kron(eye, w1.T.astype(f32))           # (128, hid_lanes)
    w2_bd = jnp.kron(eye, w2.T.astype(f32))           # (hid_lanes, 128)
    b1_slab = jnp.tile(b1.astype(f32), rpr).reshape(1, hid_lanes)
    b2_slab = jnp.tile(b2.astype(f32), rpr).reshape(1, _LANES)

    r_slab = r_tile // rpr                            # slab rows per grid step (mult of 8)

    y_slab = pl.pallas_call(
        _mlp_slab_kernel,
        out_shape=jax.ShapeDtypeStruct((padded_rows // rpr, _LANES), x.dtype),
        grid_spec=pl.GridSpec(
            grid=(n_tiles,),
            in_specs=[
                pl.BlockSpec((r_slab, _LANES), lambda i: (i, 0)),      # x slab tile
                pl.BlockSpec((_LANES, hid_lanes), lambda i: (0, 0)),   # W1_bd (resident)
                pl.BlockSpec((1, hid_lanes), lambda i: (0, 0)),        # b1 (tiled)
                pl.BlockSpec((hid_lanes, _LANES), lambda i: (0, 0)),   # W2_bd (resident)
                pl.BlockSpec((1, _LANES), lambda i: (0, 0)),           # b2 (tiled)
            ],
            out_specs=pl.BlockSpec((r_slab, _LANES), lambda i: (i, 0)),
        ),
        compiler_params=pltpu.CompilerParams(
            dimension_semantics=("parallel",),
        ),
    )(x_slab, w1_bd, b1_slab, w2_bd, b2_slab)

    y_flat = y_slab.reshape(-1)                       # metadata-only reshape
    if pad_elems:
        y_flat = y_flat[: rows * in_f]                # drop padded rows
    return y_flat.reshape(orig_shape)                 # y.view(x.shape)


def init_params(key, in_features, width, out_features):
    """PyTorch-Linear-style uniform init; weights kept in PyTorch (out, in) layout."""
    k1, k2, k3, k4 = jax.random.split(key, 4)
    bound1 = 1.0 / jnp.sqrt(in_features)
    bound2 = 1.0 / jnp.sqrt(width)
    w1 = jax.random.uniform(k1, (width, in_features), jnp.float32, -bound1, bound1)
    b1 = jax.random.uniform(k2, (width,), jnp.float32, -bound1, bound1)
    w2 = jax.random.uniform(k3, (out_features, width), jnp.float32, -bound2, bound2)
    b2 = jax.random.uniform(k4, (out_features,), jnp.float32, -bound2, bound2)
    return w1, b1, w2, b2


def mlp_reference(x, w1, b1, w2, b2):
    x2d = x.reshape(-1, x.shape[-1])
    h = jnp.tanh(x2d @ w1.T + b1)
    y = h @ w2.T + b2
    return y.reshape(x.shape)


if __name__ == "__main__":
    # MLP(in_features=4, out_features=4, width=32, n_hidden_layers=1,
    #     activation='tanh', bias=True)
    in_features = 4
    out_features = 4
    width = 32

    key = jax.random.PRNGKey(0)
    kx, kp = jax.random.split(key)

    # x: (2, 64, 4) -> 128 rows -> padded to one 256-row (8x128 slab) tile, grid=(1,).
    x = jax.random.normal(kx, (2, 64, in_features), jnp.float32)
    w1, b1, w2, b2 = init_params(kp, in_features, width, out_features)

    y = mlp_forward(x, w1, b1, w2, b2)
    y = jax.block_until_ready(y)

    y_ref = mlp_reference(x, w1, b1, w2, b2)
    assert y.shape == x.shape
    assert jnp.allclose(y, y_ref, atol=1e-5, rtol=1e-5)

    print("KERNEL_OK")
</pallas_src>

<mosaic_0001>
module attributes {stable_mosaic.version = 11 : i64} {
  func.func @_mlp_slab_kernel(%arg0: i32, %arg1: memref<8x128xf32, #tpu.memory_space<vmem>>, %arg2: memref<128x1024xf32, #tpu.memory_space<vmem>>, %arg3: memref<1x1024xf32, #tpu.memory_space<vmem>>, %arg4: memref<1024x128xf32, #tpu.memory_space<vmem>>, %arg5: memref<1x128xf32, #tpu.memory_space<vmem>>, %arg6: memref<8x128xf32, #tpu.memory_space<vmem>>) attributes {dimension_semantics = [#tpu.dimension_semantics<parallel>], iteration_bounds = array<i64: 1>, scalar_prefetch = 0 : i64, scratch_operands = 0 : i64, tpu.core_type = #tpu.core_type<tc>, window_params = [{transform_indices = @transform_0, window_bounds = array<i64: 8, 128>}, {pipeline_mode = #tpu.pipeline_mode<synchronous>, transform_indices = @transform_1, window_bounds = array<i64: 128, 1024>}, {pipeline_mode = #tpu.pipeline_mode<synchronous>, transform_indices = @transform_2, window_bounds = array<i64: 1, 1024>}, {pipeline_mode = #tpu.pipeline_mode<synchronous>, transform_indices = @transform_3, window_bounds = array<i64: 1024, 128>}, {pipeline_mode = #tpu.pipeline_mode<synchronous>, transform_indices = @transform_4, window_bounds = array<i64: 1, 128>}, {transform_indices = @transform_5, window_bounds = array<i64: 8, 128>}]} {
    %c0 = arith.constant 0 : index
    %c0_0 = arith.constant 0 : index
    %0 = vector.load %arg1[%c0, %c0_0] : memref<8x128xf32, #tpu.memory_space<vmem>>, vector<8x128xf32>
    %c0_1 = arith.constant 0 : index
    %c0_2 = arith.constant 0 : index
    %1 = vector.load %arg2[%c0_1, %c0_2] : memref<128x1024xf32, #tpu.memory_space<vmem>>, vector<128x1024xf32>
    %cst = arith.constant dense<0.000000e+00> : vector<8x1024xf32>
    %2 = tpu.matmul %0, %1, %cst {dimension_numbers = #tpu.dot_dimension_numbers<[1], [0], [0], [1], [0, 0, 1, 1], [], []>} : vector<8x128xf32>, vector<128x1024xf32>, vector<8x1024xf32> -> vector<8x1024xf32>
    %c0_3 = arith.constant 0 : index
    %c0_4 = arith.constant 0 : index
    %3 = vector.load %arg3[%c0_3, %c0_4] : memref<1x1024xf32, #tpu.memory_space<vmem>>, vector<1x1024xf32>
    %4 = vector.broadcast %3 : vector<1x1024xf32> to vector<8x1024xf32>
    %5 = arith.addf %2, %4 : vector<8x1024xf32>
    %6 = math.tanh %5 : vector<8x1024xf32>
    %c0_5 = arith.constant 0 : index
    %c0_6 = arith.constant 0 : index
    %7 = vector.load %arg4[%c0_5, %c0_6] : memref<1024x128xf32, #tpu.memory_space<vmem>>, vector<1024x128xf32>
    %cst_7 = arith.constant dense<0.000000e+00> : vector<8x128xf32>
    %8 = tpu.matmul %6, %7, %cst_7 {dimension_numbers = #tpu.dot_dimension_numbers<[1], [0], [0], [1], [0, 0, 1, 1], [], []>} : vector<8x1024xf32>, vector<1024x128xf32>, vector<8x128xf32> -> vector<8x128xf32>
    %c0_8 = arith.constant 0 : index
    %c0_9 = arith.constant 0 : index
    %9 = vector.load %arg5[%c0_8, %c0_9] : memref<1x128xf32, #tpu.memory_space<vmem>>, vector<1x128xf32>
    %10 = vector.broadcast %9 : vector<1x128xf32> to vector<8x128xf32>
    %11 = arith.addf %8, %10 : vector<8x128xf32>
    %c0_10 = arith.constant 0 : index
    %c0_11 = arith.constant 0 : index
    %12 = vector.load %arg6[%c0_10, %c0_11] : memref<8x128xf32, #tpu.memory_space<vmem>>, vector<8x128xf32>
    tpu.vector_store %arg6[%c0_10, %c0_11], %11 {strides = array<i32>} : memref<8x128xf32, #tpu.memory_space<vmem>>, vector<8x128xf32>,
    return
  }
  func.func @transform_0(%arg0: i32) -> (i32, i32) {
    %c0_i32 = arith.constant 0 : i32
    %c0_i32_0 = arith.constant 0 : i32
    return %arg0, %c0_i32 : i32, i32
  }
  func.func @transform_1(%arg0: i32) -> (i32, i32) {
    %c0_i32 = arith.constant 0 : i32
    %c0_i32_0 = arith.constant 0 : i32
    %c0_i32_1 = arith.constant 0 : i32
    return %c0_i32, %c0_i32_0 : i32, i32
  }
  func.func @transform_2(%arg0: i32) -> (i32, i32) {
    %c0_i32 = arith.constant 0 : i32
    %c0_i32_0 = arith.constant 0 : i32
    %c0_i32_1 = arith.constant 0 : i32
    return %c0_i32, %c0_i32_0 : i32, i32
  }
  func.func @transform_3(%arg0: i32) -> (i32, i32) {
    %c0_i32 = arith.constant 0 : i32
    %c0_i32_0 = arith.constant 0 : i32
    %c0_i32_1 = arith.constant 0 : i32
    return %c0_i32, %c0_i32_0 : i32, i32
  }
  func.func @transform_4(%arg0: i32) -> (i32, i32) {
    %c0_i32 = arith.constant 0 : i32
    %c0_i32_0 = arith.constant 0 : i32
    %c0_i32_1 = arith.constant 0 : i32
    return %c0_i32, %c0_i32_0 : i32, i32
  }
  func.func @transform_5(%arg0: i32) -> (i32, i32) {
    %c0_i32 = arith.constant 0 : i32
    %c0_i32_0 = arith.constant 0 : i32
    return %arg0, %c0_i32 : i32, i32
  }
}

</mosaic_0001>

<bundles_post_ra>
// kernel: tpu_custom_call.1
= control target key start
LH: loop header
LB: loop body
LE: loop exit
PB: predicated region body
PF: predicated region fallthrough
CT: control target
= control target key end

     0   :  { %10 = vsyncpa [#allocation3], 0  ;;  %s1642_s0 = inlined_call_operand.hbm [shape: f32[8,128], index: 0, kind: input, shape index: {}]   ;;  %s1643_s1 = inlined_call_operand.hbm [shape: f32[128,1024], index: 1, kind: input, shape index: {}]   ;;  %s1644_s2 = inlined_call_operand.hbm [shape: f32[1,1024], index: 2, kind: input, shape index: {}]   ;;  %s1645_s3 = inlined_call_operand.hbm [shape: f32[1024,128], index: 3, kind: input, shape index: {}]   ;;  %s1646_s4 = inlined_call_operand.vmem [shape: f32[1,128], index: 4, kind: input, shape index: {}]   ;;  %s1647_s5 = inlined_call_operand.hbm [shape: f32[8,128], index: 5, kind: output, shape index: {}]  }
   0x1   :  { %11 = vsyncpa [#allocation6], 0 }
   0x2   :  { %12 = vsyncpa [#allocation9], 0 }
   0x3   :  { %13 = vsyncpa [#allocation4], 0  ;;  %s1509_s18 = smov [#allocation5]   ;;  %s1391_s22 = scalar_lea.hbm %s1643_s1, 16384 }
   0x4   :  { %s29_s19 = sshll.u32 %s1509_s18, 4  ;;  %p1392_p0 = scmp.ne.s32.totalorder %s1643_s1, %s1391_s22  ;;  %s30_s19 = int_to_ptr.vmem [resolvable:$true] %s29_s19 }
   0x5   :  { %p1395_p1 = scmp.lt.u32.totalorder %s1391_s22, %s1643_s1 }
   0x7   :  { %p1397_p2 = pnand %p1395_p1, %p1392_p0 }
   0x9   :  { %1400 = shalt.err (!%p1397_p2)
}
   0xa   :  { %s1401_s27 = scalar_lea.vmem %s30_s19, 16384  ;;  %p1406_p4 = scmp.lt.s32.totalorder %s30_s19, %s30_s19 }
   0xb   :  { %p1402_p3 = scmp.ne.s32.totalorder %s30_s19, %s1401_s27  ;;  %p1407_p5 = scmp.lt.s32.totalorder %s1401_s27, %s1401_s27 }
   0xd   :  { %p1408_p6 = por %p1407_p5, %p1406_p4 }
   0xf   :  { %p1409_p7 = pnand %p1408_p6, %p1402_p3 }
  0x11   :  { %1412 = shalt.err (!%p1409_p7)
}
  0x12   :  { %s1510_s28 = smov 1024   ;;  %s1511_s29 = smov 64  }
  0x13   :  { %35 = dma.hbm_to_vmem [thread:$0]  %s1643_s1, 16384, %s30_s19, [#allocation6], %s1510_s28, %s1510_s28, %s1511_s29  }
  0x14   :  { %s1512_s7 = smov [#allocation2]   ;;  %s1513_s9 = smov [#allocation7]  }
  0x15   :  { %s20_s8 = sshll.u32 %s1512_s7, 4  ;;  %s42_s10 = sshll.u32 %s1513_s9, 4  ;;  %s21_s8 = int_to_ptr.vmem [resolvable:$true] %s20_s8  ;;  %s43_s10 = int_to_ptr.vmem [resolvable:$true] %s42_s10 }
  0x16   :  { %s1413_s13 = scalar_lea.hbm %s1642_s0, 128 }
  0x17   :  { %p1414_p8 = scmp.ne.s32.totalorder %s1642_s0, %s1413_s13  ;;  %p1417_p9 = scmp.lt.u32.totalorder %s1413_s13, %s1642_s0 }
  0x19   :  { %p1419_p10 = pnand %p1417_p9, %p1414_p8 }
  0x1b   :  { %1422 = shalt.err (!%p1419_p10)
}
  0x1c   :  { %s1423_s1 = scalar_lea.vmem %s21_s8, 128  ;;  %p1428_p12 = scmp.lt.s32.totalorder %s21_s8, %s21_s8 }
  0x1d   :  { %p1424_p11 = scmp.ne.s32.totalorder %s21_s8, %s1423_s1  ;;  %p1429_p13 = scmp.lt.s32.totalorder %s1423_s1, %s1423_s1 }
  0x1f   :  { %p1430_p0 = por %p1429_p13, %p1428_p12 }
  0x21   :  { %p1431_p1 = pnand %p1430_p0, %p1424_p11 }
  0x23   :  { %1434 = shalt.err (!%p1431_p1)
}
  0x24   :  { %23 = dma.hbm_to_vmem [thread:$0]  %s1642_s0, 128, %s21_s8, [#allocation3]  }
  0x25   :  { %s1435_s22 = scalar_lea.hbm %s1644_s2, 128 }
  0x26   :  { %p1436_p2 = scmp.ne.s32.totalorder %s1644_s2, %s1435_s22  ;;  %p1439_p3 = scmp.lt.u32.totalorder %s1435_s22, %s1644_s2 }
  0x28   :  { %p1441_p4 = pnand %p1439_p3, %p1436_p2 }
  0x2a   :  { %1444 = shalt.err (!%p1441_p4)
}
  0x2b   :  { %s1445_s27 = scalar_lea.vmem %s43_s10, 128  ;;  %p1450_p6 = scmp.lt.s32.totalorder %s43_s10, %s43_s10 }
  0x2c   :  { %p1446_p5 = scmp.ne.s32.totalorder %s43_s10, %s1445_s27  ;;  %p1451_p7 = scmp.lt.s32.totalorder %s1445_s27, %s1445_s27 }
  0x2e   :  { %p1452_p8 = por %p1451_p7, %p1450_p6 }
  0x30   :  { %p1453_p9 = pnand %p1452_p8, %p1446_p5 }
  0x32   :  { %1456 = shalt.err (!%p1453_p9)
}
  0x33   :  { %45 = dma.hbm_to_vmem [thread:$0]  %s1644_s2, 128, %s43_s10, [#allocation6]  }
  0x34   :  { %s1514_s29 = smov [#allocation8]   ;;  %s1457_s8 = scalar_lea.hbm %s1645_s3, 16384 }
  0x35   :  { %s51_s30 = sshll.u32 %s1514_s29, 4  ;;  %p1458_p10 = scmp.ne.s32.totalorder %s1645_s3, %s1457_s8  ;;  %s52_s30 = int_to_ptr.vmem [resolvable:$true] %s51_s30 }
  0x36   :  { %p1461_p11 = scmp.lt.u32.totalorder %s1457_s8, %s1645_s3 }
  0x38   :  { %p1463_p12 = pnand %p1461_p11, %p1458_p10 }
  0x3a   :  { %1466 = shalt.err (!%p1463_p12)
}
  0x3b   :  { %s1467_s14 = scalar_lea.vmem %s52_s30, 16384  ;;  %p1472_p0 = scmp.lt.s32.totalorder %s52_s30, %s52_s30 }
  0x3c   :  { %p1468_p13 = scmp.ne.s32.totalorder %s52_s30, %s1467_s14  ;;  %p1473_p1 = scmp.lt.s32.totalorder %s1467_s14, %s1467_s14 }
  0x3e   :  { %p1474_p2 = por %p1473_p1, %p1472_p0 }
  0x40   :  { %p1475_p3 = pnand %p1474_p2, %p1468_p13 }
  0x42   :  { %1478 = shalt.err (!%p1475_p3)
}
  0x43   :  { %s1515_s2 = smov 128   ;;  %s1516_s10 = smov 8  }
  0x44   :  { %57 = dma.hbm_to_vmem [thread:$0]  %s1645_s3, 16384, %s52_s30, [#allocation9], %s1515_s2, %s1515_s2, %s1516_s10  }
  0x45   :  { %1501 = dma.done.wait [#allocation3], 128  }
  0x46   :  { %1502 = vsyncadd [#allocation3], 4294967168 }
  0x47   :  { %1503 = dma.done.wait [#allocation6], 16512  }
  0x48   :  { %1504 = vsyncadd [#allocation6], 4294950784 }
  0x49   :  { %1505 = dma.done.wait [#allocation9], 16384  }
  0x4a   :  { %1506 = vsyncadd [#allocation9], 4294950912  ;;  %v1517_v0 = vmov 0.0   ;;  %v74_v1 = vld [vmem:[#allocation5 + $0x8] sm:$0xff]  ;;  %v76_v3 = vld [vmem:[#allocation5 + $0x18] sm:$0xff]  ;;  %s1518_s1 = smov [#allocation10]  }
  0x4b   :  { %307 = vmatprep.mubr.f32.mxu0 %v1517_v0  ;;  %378 = vmatprep.mubr.f32.mxu1 %v1517_v0  ;;  %v82_v2 = vld [vmem:[#allocation5 + $0x48] sm:$0xff]  ;;  %v84_v5 = vld [vmem:[#allocation5 + $0x58] sm:$0xff]  ;;  %v73_v6 = vld [vmem:[#allocation5] sm:$0xff]  ;;  %s957_s18 = sshll.u32 %s1518_s1, 4  ;;  %s958_s18 = int_to_ptr.vmem [resolvable:$true] %s957_s18 }
  0x4c   :  { %v1109_v4 = vpack.c.bf16 %v82_v2, %v74_v1  ;;  %v81_v7 = vld [vmem:[#allocation5 + $0x40] sm:$0xff]  ;;  %v1141_v8 = vpack.c.bf16 %v84_v5, %v76_v3  ;;  %v75_v10 = vld [vmem:[#allocation5 + $0x10] sm:$0xff]  ;;  %v90_v12 = vld [vmem:[#allocation5 + $0x88] sm:$0xff]  ;;  %s1479_s19 = scalar_lea.vmem %s958_s18, 128  ;;  %p1484_p5 = scmp.lt.s32.totalorder %s958_s18, %s958_s18 }
  0x4d   :  { %v1111_v9 = vpack.c.bf16 %v81_v7, %v73_v6  ;;  %v83_v11 = vld [vmem:[#allocation5 + $0x50] sm:$0xff]  ;;  %v98_v14 = vld [vmem:[#allocation5 + $0xc8] sm:$0xff]  ;;  %v92_v15 = vld [vmem:[#allocation5 + $0x98] sm:$0xff]  ;;  %p1480_p4 = scmp.ne.s32.totalorder %s958_s18, %s1479_s19  ;;  %p1485_p6 = scmp.lt.s32.totalorder %s1479_s19, %s1479_s19 }
  0x4e   :  { %1110 = vmatprep.subr.bf16.mxu0 %v1109_v4  ;;  %v1143_v13 = vpack.c.bf16 %v83_v11, %v75_v10  ;;  %v100_v16 = vld [vmem:[#allocation5 + $0xd8] sm:$0xff]  ;;  %1142 = vmatprep.subr.bf16.mxu1 %v1141_v8  ;;  %v1113_v17 = vpack.c.bf16 %v98_v14, %v90_v12  ;;  %v89_v19 = vld [vmem:[#allocation5 + $0x80] sm:$0xff]  ;;  %v91_v21 = vld [vmem:[#allocation5 + $0x90] sm:$0xff] }
  0x4f   :  { %1112 = vmatpush1.bf16.msra.mxu0 %v1111_v9  ;;  %v1145_v18 = vpack.c.bf16 %v100_v16, %v92_v15  ;;  %v97_v20 = vld [vmem:[#allocation5 + $0xc0] sm:$0xff]  ;;  %v99_v23 = vld [vmem:[#allocation5 + $0xd0] sm:$0xff]  ;;  %v106_v24 = vld [vmem:[#allocation5 + $0x108] sm:$0xff]  ;;  %p1486_p7 = por %p1485_p6, %p1484_p5 }
  0x50   :  { %1144 = vmatpush1.bf16.msra.mxu1 %v1143_v13  ;;  %v1115_v22 = vpack.c.bf16 %v97_v20, %v89_v19  ;;  %v114_v25 = vld [vmem:[#allocation5 + $0x148] sm:$0xff]  ;;  %1114 = vmatprep.subr.bf16.mxu0 %v1113_v17  ;;  %v1147_v26 = vpack.c.bf16 %v99_v23, %v91_v21  ;;  %v108_v28 = vld [vmem:[#allocation5 + $0x118] sm:$0xff]  ;;  %v105_v30 = vld [vmem:[#allocation5 + $0x100] sm:$0xff] }
  0x51   :  { %1146 = vmatprep.subr.bf16.mxu1 %v1145_v18  ;;  %v1117_v27 = vpack.c.bf16 %v114_v25, %v106_v24  ;;  %v116_v29 = vld [vmem:[#allocation5 + $0x158] sm:$0xff]  ;;  %v113_v32 = vld [vmem:[#allocation5 + $0x140] sm:$0xff]  ;;  %v107_v33 = vld [vmem:[#allocation5 + $0x110] sm:$0xff]  ;;  %p1487_p8 = pnand %p1486_p7, %p1480_p4 }
  0x52   :  { %v1149_v31 = vpack.c.bf16 %v116_v29, %v108_v28  ;;  %v115_v34 = vld [vmem:[#allocation5 + $0x150] sm:$0xff]  ;;  %v1119_v35 = vpack.c.bf16 %v113_v32, %v105_v30  ;;  %v122_v36 = vld [vmem:[#allocation5 + $0x188] sm:$0xff]  ;;  %v124_v38 = vld [vmem:[#allocation5 + $0x198] sm:$0xff] }
  0x53   :  { %1116 = vmatpush1.bf16.msra.mxu0 %v1115_v22  ;;  %v130_v37 = vld [vmem:[#allocation5 + $0x1c8] sm:$0xff]  ;;  %v1151_v39 = vpack.c.bf16 %v115_v34, %v107_v33  ;;  %v132_v41 = vld [vmem:[#allocation5 + $0x1d8] sm:$0xff]  ;;  %v121_v42 = vld [vmem:[#allocation5 + $0x180] sm:$0xff] }
  0x54   :  { %1148 = vmatpush1.bf16.msra.mxu1 %v1147_v26  ;;  %1118 = vmatprep.subr.bf16.mxu0 %v1117_v27  ;;  %v1121_v40 = vpack.c.bf16 %v130_v37, %v122_v36  ;;  %v129_v43 = vld [vmem:[#allocation5 + $0x1c0] sm:$0xff]  ;;  %v1153_v44 = vpack.c.bf16 %v132_v41, %v124_v38  ;;  %v123_v45 = vld [vmem:[#allocation5 + $0x190] sm:$0xff]  ;;  %v138_v47 = vld [vmem:[#allocation5 + $0x208] sm:$0xff] }
  0x55   :  { %1150 = vmatprep.subr.bf16.mxu1 %v1149_v31  ;;  %v131_v46 = vld [vmem:[#allocation5 + $0x1d0] sm:$0xff]  ;;  %v146_v48 = vld [vmem:[#allocation5 + $0x248] sm:$0xff]  ;;  %v140_v49 = vld [vmem:[#allocation5 + $0x218] sm:$0xff]  ;;  %v1123_v51 = vpack.c.bf16 %v129_v43, %v121_v42 }
  0x56   :  { %v148_v50 = vld [vmem:[#allocation5 + $0x258] sm:$0xff]  ;;  %v1155_v52 = vpack.c.bf16 %v131_v46, %v123_v45  ;;  %v1125_v53 = vpack.c.bf16 %v146_v48, %v138_v47  ;;  %v137_v54 = vld [vmem:[#allocation5 + $0x200] sm:$0xff]  ;;  %v139_v56 = vld [vmem:[#allocation5 + $0x210] sm:$0xff] }
  0x57   :  { %1120 = vmatpush1.bf16.msra.mxu0 %v1119_v35  ;;  %v145_v55 = vld [vmem:[#allocation5 + $0x240] sm:$0xff]  ;;  %v1157_v57 = vpack.c.bf16 %v148_v50, %v140_v49  ;;  %v147_v58 = vld [vmem:[#allocation5 + $0x250] sm:$0xff]  ;;  %v154_v59 = vld [vmem:[#allocation5 + $0x288] sm:$0xff] }
  0x58   :  { %1152 = vmatpush1.bf16.msra.mxu1 %v1151_v39  ;;  %1122 = vmatprep.subr.bf16.mxu0 %v1121_v40  ;;  %v162_v60 = vld [vmem:[#allocation5 + $0x2c8] sm:$0xff]  ;;  %v156_v61 = vld [vmem:[#allocation5 + $0x298] sm:$0xff]  ;;  %v1127_v63 = vpack.c.bf16 %v145_v55, %v137_v54  ;;  %v1159_v1 = vpack.c.bf16 %v147_v58, %v139_v56  ;;  %v153_v3 = vld [vmem:[#allocation5 + $0x280] sm:$0xff] }
  0x59   :  { %1154 = vmatprep.subr.bf16.mxu1 %v1153_v44  ;;  %v164_v62 = vld [vmem:[#allocation5 + $0x2d8] sm:$0xff]  ;;  %v1129_v2 = vpack.c.bf16 %v162_v60, %v154_v59  ;;  %v161_v4 = vld [vmem:[#allocation5 + $0x2c0] sm:$0xff]  ;;  %v155_v5 = vld [vmem:[#allocation5 + $0x290] sm:$0xff] }
  0x5a   :  { %v1161_v6 = vpack.c.bf16 %v164_v62, %v156_v61  ;;  %v163_v7 = vld [vmem:[#allocation5 + $0x2d0] sm:$0xff]  ;;  %v170_v8 = vld [vmem:[#allocation5 + $0x308] sm:$0xff]  ;;  %v172_v10 = vld [vmem:[#allocation5 + $0x318] sm:$0xff]  ;;  %v1131_v12 = vpack.c.bf16 %v161_v4, %v153_v3 }
  0x5b   :  { %1124 = vmatpush1.bf16.msra.mxu0 %v1123_v51  ;;  %v178_v9 = vld [vmem:[#allocation5 + $0x348] sm:$0xff]  ;;  %v180_v11 = vld [vmem:[#allocation5 + $0x358] sm:$0xff]  ;;  %v1163_v13 = vpack.c.bf16 %v163_v7, %v155_v5  ;;  %v169_v15 = vld [vmem:[#allocation5 + $0x300] sm:$0xff] }
  0x5c   :  { %1156 = vmatpush1.bf16.msra.mxu1 %v1155_v52  ;;  %1126 = vmatprep.subr.bf16.mxu0 %v1125_v53  ;;  %v1133_v14 = vpack.c.bf16 %v178_v9, %v170_v8  ;;  %v177_v16 = vld [vmem:[#allocation5 + $0x340] sm:$0xff]  ;;  %v171_v17 = vld [vmem:[#allocation5 + $0x310] sm:$0xff]  ;;  %v1165_v18 = vpack.c.bf16 %v180_v11, %v172_v10  ;;  %v186_v20 = vld [vmem:[#allocation5 + $0x388] sm:$0xff] }
  0x5d   :  { %1158 = vmatprep.subr.bf16.mxu1 %v1157_v57  ;;  %v179_v19 = vld [vmem:[#allocation5 + $0x350] sm:$0xff]  ;;  %v194_v21 = vld [vmem:[#allocation5 + $0x3c8] sm:$0xff]  ;;  %v188_v22 = vld [vmem:[#allocation5 + $0x398] sm:$0xff]  ;;  %v1135_v24 = vpack.c.bf16 %v177_v16, %v169_v15 }
  0x5e   :  { %v196_v23 = vld [vmem:[#allocation5 + $0x3d8] sm:$0xff]  ;;  %v1167_v25 = vpack.c.bf16 %v179_v19, %v171_v17  ;;  %v1137_v26 = vpack.c.bf16 %v194_v21, %v186_v20  ;;  %v185_v27 = vld [vmem:[#allocation5 + $0x380] sm:$0xff]  ;;  %v187_v29 = vld [vmem:[#allocation5 + $0x390] sm:$0xff] }
  0x5f   :  { %1128 = vmatpush1.bf16.msra.mxu0 %v1127_v63  ;;  %v193_v28 = vld [vmem:[#allocation5 + $0x3c0] sm:$0xff]  ;;  %v1169_v30 = vpack.c.bf16 %v196_v23, %v188_v22  ;;  %v195_v31 = vld [vmem:[#allocation5 + $0x3d0] sm:$0xff]  ;;  %v78_v32 = vld [vmem:[#allocation5 + $0x28] sm:$0xff] }
  0x60   :  { %1160 = vmatpush1.bf16.msra.mxu1 %v1159_v1  ;;  %1130 = vmatprep.subr.bf16.mxu0 %v1129_v2  ;;  %v86_v33 = vld [vmem:[#allocation5 + $0x68] sm:$0xff]  ;;  %v80_v34 = vld [vmem:[#allocation5 + $0x38] sm:$0xff]  ;;  %v1139_v36 = vpack.c.bf16 %v193_v28, %v185_v27  ;;  %v1171_v37 = vpack.c.bf16 %v195_v31, %v187_v29  ;;  %v77_v39 = vld [vmem:[#allocation5 + $0x20] sm:$0xff] }
  0x61   :  { %1162 = vmatprep.subr.bf16.mxu1 %v1161_v6  ;;  %v88_v35 = vld [vmem:[#allocation5 + $0x78] sm:$0xff]  ;;  %v1173_v38 = vpack.c.bf16 %v86_v33, %v78_v32  ;;  %v85_v40 = vld [vmem:[#allocation5 + $0x60] sm:$0xff]  ;;  %v79_v41 = vld [vmem:[#allocation5 + $0x30] sm:$0xff] }
  0x62   :  { %v1205_v42 = vpack.c.bf16 %v88_v35, %v80_v34  ;;  %v87_v43 = vld [vmem:[#allocation5 + $0x70] sm:$0xff]  ;;  %v94_v44 = vld [vmem:[#allocation5 + $0xa8] sm:$0xff]  ;;  %v96_v46 = vld [vmem:[#allocation5 + $0xb8] sm:$0xff]  ;;  %v1175_v49 = vpack.c.bf16 %v85_v40, %v77_v39 }
  0x63   :  { %1132 = vmatpush1.bf16.msra.mxu0 %v1131_v12  ;;  %v102_v45 = vld [vmem:[#allocation5 + $0xe8] sm:$0xff]  ;;  %v104_v47 = vld [vmem:[#allocation5 + $0xf8] sm:$0xff]  ;;  %v1207_v50 = vpack.c.bf16 %v87_v43, %v79_v41  ;;  %v93_v52 = vld [vmem:[#allocation5 + $0xa0] sm:$0xff] }
  0x64   :  { %1164 = vmatpush1.bf16.msra.mxu1 %v1163_v13  ;;  %1134 = vmatprep.subr.bf16.mxu0 %v1133_v14  ;;  %v1599_v48 = vld [vmem:[#allocation2] sm:$0xff]  ;;  %v1177_v51 = vpack.c.bf16 %v102_v45, %v94_v44  ;;  %v101_v53 = vld [vmem:[#allocation5 + $0xe0] sm:$0xff]  ;;  %v95_v54 = vld [vmem:[#allocation5 + $0xb0] sm:$0xff]  ;;  %v1209_v55 = vpack.c.bf16 %v104_v47, %v96_v46 }
  0x65   :  { %1166 = vmatprep.subr.bf16.mxu1 %v1165_v18  ;;  %v103_v56 = vld [vmem:[#allocation5 + $0xf0] sm:$0xff]  ;;  %v110_v57 = vld [vmem:[#allocation5 + $0x128] sm:$0xff]  ;;  %v112_v59 = vld [vmem:[#allocation5 + $0x138] sm:$0xff]  ;;  %v1179_v61 = vpack.c.bf16 %v101_v53, %v93_v52 }
  0x66   :  { %v118_v58 = vld [vmem:[#allocation5 + $0x168] sm:$0xff]  ;;  %v120_v60 = vld [vmem:[#allocation5 + $0x178] sm:$0xff]  ;;  %v1211_v62 = vpack.c.bf16 %v103_v56, %v95_v54  ;;  %v109_v1 = vld [vmem:[#allocation5 + $0x120] sm:$0xff] }
  0x67   :  { %1136 = vmatpush1.bf16.msra.mxu0 %v1135_v24  ;;  %v1181_v63 = vpack.c.bf16 %v118_v58, %v110_v57  ;;  %v117_v2 = vld [vmem:[#allocation5 + $0x160] sm:$0xff]  ;;  %v111_v3 = vld [vmem:[#allocation5 + $0x130] sm:$0xff]  ;;  %v1213_v4 = vpack.c.bf16 %v120_v60, %v112_v59  ;;  %v126_v6 = vld [vmem:[#allocation5 + $0x1a8] sm:$0xff] }
  0x68   :  { %1168 = vmatpush1.bf16.msra.mxu1 %v1167_v25  ;;  %1138 = vmatprep.subr.bf16.mxu0 %v1137_v26  ;;  %v119_v5 = vld [vmem:[#allocation5 + $0x170] sm:$0xff]  ;;  %v134_v7 = vld [vmem:[#allocation5 + $0x1e8] sm:$0xff]  ;;  %v128_v8 = vld [vmem:[#allocation5 + $0x1b8] sm:$0xff]  ;;  %v1183_v10 = vpack.c.bf16 %v117_v2, %v109_v1 }
  0x69   :  { %1170 = vmatprep.subr.bf16.mxu1 %v1169_v30  ;;  %v136_v9 = vld [vmem:[#allocation5 + $0x1f8] sm:$0xff]  ;;  %v1215_v11 = vpack.c.bf16 %v119_v5, %v111_v3  ;;  %v1185_v12 = vpack.c.bf16 %v134_v7, %v126_v6  ;;  %v125_v13 = vld [vmem:[#allocation5 + $0x1a0] sm:$0xff]  ;;  %v127_v15 = vld [vmem:[#allocation5 + $0x1b0] sm:$0xff] }
  0x6a   :  { %v133_v14 = vld [vmem:[#allocation5 + $0x1e0] sm:$0xff]  ;;  %v1217_v16 = vpack.c.bf16 %v136_v9, %v128_v8  ;;  %v135_v17 = vld [vmem:[#allocation5 + $0x1f0] sm:$0xff]  ;;  %v142_v18 = vld [vmem:[#allocation5 + $0x228] sm:$0xff] }
  0x6b   :  { %1140 = vmatpush1.bf16.msra.mxu0 %v1139_v36  ;;  %v150_v19 = vld [vmem:[#allocation5 + $0x268] sm:$0xff]  ;;  %v144_v20 = vld [vmem:[#allocation5 + $0x238] sm:$0xff]  ;;  %v1187_v22 = vpack.c.bf16 %v133_v14, %v125_v13  ;;  %v141_v24 = vld [vmem:[#allocation5 + $0x220] sm:$0xff] }
  0x6c   :  { %1172 = vmatpush1.bf16.msra.mxu1 %v1171_v37  ;;  %1174 = vmatprep.subr.bf16.mxu0 %v1173_v38  ;;  %v152_v21 = vld [vmem:[#allocation5 + $0x278] sm:$0xff]  ;;  %v1189_v23 = vpack.c.bf16 %v150_v19, %v142_v18  ;;  %v149_v25 = vld [vmem:[#allocation5 + $0x260] sm:$0xff]  ;;  %v143_v26 = vld [vmem:[#allocation5 + $0x230] sm:$0xff] }
  0x6d   :  { %1206 = vmatprep.subr.bf16.mxu1 %v1205_v42  ;;  %v1221_v27 = vpack.c.bf16 %v152_v21, %v144_v20  ;;  %v151_v28 = vld [vmem:[#allocation5 + $0x270] sm:$0xff]  ;;  %v158_v29 = vld [vmem:[#allocation5 + $0x2a8] sm:$0xff]  ;;  %v160_v31 = vld [vmem:[#allocation5 + $0x2b8] sm:$0xff]  ;;  %v1191_v33 = vpack.c.bf16 %v149_v25, %v141_v24 }
  0x6e   :  { %308 = vmatmul.mubr.f32.vlgmr.msra.gmra.mrb[0].mxu0 %v1599_v48  ;;  %v166_v30 = vld [vmem:[#allocation5 + $0x2e8] sm:$0xff]  ;;  %v168_v32 = vld [vmem:[#allocation5 + $0x2f8] sm:$0xff]  ;;  %v1223_v34 = vpack.c.bf16 %v151_v28, %v143_v26  ;;  %v157_v36 = vld [vmem:[#allocation5 + $0x2a0] sm:$0xff] }
  0x6f   :  { %379 = vmatmul.mubr.f32.vlgmr.msra.gmra.mrb[0].mxu1 %v1599_v48  ;;  %1176 = vmatpush1.bf16.msra.mxu0 %v1175_v49  ;;  %v1193_v35 = vpack.c.bf16 %v166_v30, %v158_v29  ;;  %v165_v37 = vld [vmem:[#allocation5 + $0x2e0] sm:$0xff]  ;;  %v159_v38 = vld [vmem:[#allocation5 + $0x2b0] sm:$0xff]  ;;  %v1225_v39 = vpack.c.bf16 %v168_v32, %v160_v31  ;;  %v174_v41 = vld [vmem:[#allocation5 + $0x328] sm:$0xff] }
  0x70   :  { %1208 = vmatpush1.bf16.msra.mxu1 %v1207_v50  ;;  %1178 = vmatprep.subr.bf16.mxu0 %v1177_v51  ;;  %v167_v40 = vld [vmem:[#allocation5 + $0x2f0] sm:$0xff]  ;;  %v182_v42 = vld [vmem:[#allocation5 + $0x368] sm:$0xff]  ;;  %v176_v43 = vld [vmem:[#allocation5 + $0x338] sm:$0xff]  ;;  %v1195_v45 = vpack.c.bf16 %v165_v37, %v157_v36 }
  0x71   :  { %1210 = vmatprep.subr.bf16.mxu1 %v1209_v55  ;;  %449 = vmatprep.mubr.f32.mxu0 %v1517_v0  ;;  %v184_v44 = vld [vmem:[#allocation5 + $0x378] sm:$0xff]  ;;  %v1227_v46 = vpack.c.bf16 %v167_v40, %v159_v38  ;;  %v1197_v47 = vpack.c.bf16 %v182_v42, %v174_v41  ;;  %v173_v49 = vld [vmem:[#allocation5 + $0x320] sm:$0xff]  ;;  %v175_v51 = vld [vmem:[#allocation5 + $0x330] sm:$0xff] }
  0x72   :  { %520 = vmatprep.mubr.f32.mxu1 %v1517_v0  ;;  %v1219_v0 = vpack.c.bf16 %v135_v17, %v127_v15  ;;  %v181_v50 = vld [vmem:[#allocation5 + $0x360] sm:$0xff]  ;;  %v1229_v52 = vpack.c.bf16 %v184_v44, %v176_v43  ;;  %v183_v53 = vld [vmem:[#allocation5 + $0x370] sm:$0xff]  ;;  %v190_v54 = vld [vmem:[#allocation5 + $0x3a8] sm:$0xff] }
  0x73   :  { %1180 = vmatpush1.bf16.msra.mxu0 %v1179_v61  ;;  %v198_v55 = vld [vmem:[#allocation5 + $0x3e8] sm:$0xff]  ;;  %v192_v56 = vld [vmem:[#allocation5 + $0x3b8] sm:$0xff]  ;;  %v1199_v58 = vpack.c.bf16 %v181_v50, %v173_v49  ;;  %v1231_v59 = vpack.c.bf16 %v183_v53, %v175_v51  ;;  %v189_v61 = vld [vmem:[#allocation5 + $0x3a0] sm:$0xff] }
  0x74   :  { %1212 = vmatpush1.bf16.msra.mxu1 %v1211_v62  ;;  %1182 = vmatprep.subr.bf16.mxu0 %v1181_v63  ;;  %v200_v57 = vld [vmem:[#allocation5 + $0x3f8] sm:$0xff]  ;;  %v1201_v60 = vpack.c.bf16 %v198_v55, %v190_v54  ;;  %v197_v62 = vld [vmem:[#allocation5 + $0x3e0] sm:$0xff]  ;;  %v191_v63 = vld [vmem:[#allocation5 + $0x3b0] sm:$0xff] }
  0x75   :  { %1214 = vmatprep.subr.bf16.mxu1 %v1213_v4  ;;  %v1233_v1 = vpack.c.bf16 %v200_v57, %v192_v56  ;;  %v199_v2 = vld [vmem:[#allocation5 + $0x3f0] sm:$0xff]  ;;  %v551_v3 = vld [vmem:[#allocation8 + $0x80] sm:$0xff]  ;;  %v1203_v7 = vpack.c.bf16 %v197_v62, %v189_v61  ;;  %v553_v15 = vld [vmem:[#allocation8 + $0x90] sm:$0xff] }
  0x76   :  { %v552_v4 = vld [vmem:[#allocation8 + $0x88] sm:$0xff]  ;;  %v583_v5 = vld [vmem:[#allocation8 + $0x180] sm:$0xff]  ;;  %v1235_v8 = vpack.c.bf16 %v199_v2, %v191_v63  ;;  %v585_v17 = vld [vmem:[#allocation8 + $0x190] sm:$0xff] }
  0x77   :  { %1184 = vmatpush1.bf16.msra.mxu0 %v1183_v10  ;;  %v584_v6 = vld [vmem:[#allocation8 + $0x188] sm:$0xff]  ;;  %v1237_v9 = vpack.c.bf16 %v552_v4, %v551_v3  ;;  %v535_v10 = vld [vmem:[#allocation8] sm:$0xff]  ;;  %v586_v18 = vld [vmem:[#allocation8 + $0x198] sm:$0xff] }
  0x78   :  { %1216 = vmatpush1.bf16.msra.mxu1 %v1215_v11  ;;  %1186 = vmatprep.subr.bf16.mxu0 %v1185_v12  ;;  %v536_v11 = vld [vmem:[#allocation8 + $0x8] sm:$0xff]  ;;  %v567_v12 = vld [vmem:[#allocation8 + $0x100] sm:$0xff]  ;;  %v1269_v13 = vpack.c.bf16 %v584_v6, %v583_v5  ;;  %v1273_v24 = vpack.c.bf16 %v586_v18, %v585_v17  ;;  %v570_v25 = vld [vmem:[#allocation8 + $0x118] sm:$0xff] }
  0x79   :  { %1218 = vmatprep.subr.bf16.mxu1 %v1217_v16  ;;  %v568_v14 = vld [vmem:[#allocation8 + $0x108] sm:$0xff]  ;;  %v554_v16 = vld [vmem:[#allocation8 + $0x98] sm:$0xff]  ;;  %v1239_v19 = vpack.c.bf16 %v536_v11, %v535_v10  ;;  %v555_v26 = vld [vmem:[#allocation8 + $0xa0] sm:$0xff] }
  0x7a   :  { %v1271_v20 = vpack.c.bf16 %v568_v14, %v567_v12  ;;  %v1241_v21 = vpack.c.bf16 %v554_v16, %v553_v15  ;;  %v587_v28 = vld [vmem:[#allocation8 + $0x1a0] sm:$0xff]  ;;  %v588_v29 = vld [vmem:[#allocation8 + $0x1a8] sm:$0xff]  ;;  %v557_v38 = vld [vmem:[#allocation8 + $0xb0] sm:$0xff] }
  0x7b   :  { %1188 = vmatpush1.bf16.msra.mxu0 %v1187_v22  ;;  %v537_v22 = vld [vmem:[#allocation8 + $0x10] sm:$0xff]  ;;  %v1277_v36 = vpack.c.bf16 %v588_v29, %v587_v28  ;;  %v572_v37 = vld [vmem:[#allocation8 + $0x128] sm:$0xff]  ;;  %v590_v41 = vld [vmem:[#allocation8 + $0x1b8] sm:$0xff] }
  0x7c   :  { %1220 = vmatpush1.bf16.msra.mxu1 %v1219_v0  ;;  %1190 = vmatprep.subr.bf16.mxu0 %v1189_v23  ;;  %v538_v0 = vld [vmem:[#allocation8 + $0x18] sm:$0xff]  ;;  %v569_v23 = vld [vmem:[#allocation8 + $0x110] sm:$0xff]  ;;  %v560_v53 = vld [vmem:[#allocation8 + $0xc8] sm:$0xff] }
  0x7d   :  { %1222 = vmatprep.subr.bf16.mxu1 %v1221_v27  ;;  %v556_v27 = vld [vmem:[#allocation8 + $0xa8] sm:$0xff]  ;;  %v1243_v30 = vpack.c.bf16 %v538_v0, %v537_v22  ;;  %v1275_v31 = vpack.c.bf16 %v570_v25, %v569_v23  ;;  %v589_v40 = vld [vmem:[#allocation8 + $0x1b0] sm:$0xff]  ;;  %v574_v49 = vld [vmem:[#allocation8 + $0x138] sm:$0xff] }
  0x7e   :  { %v1245_v32 = vpack.c.bf16 %v556_v27, %v555_v26  ;;  %v541_v44 = vld [vmem:[#allocation8 + $0x30] sm:$0xff]  ;;  %v591_v54 = vld [vmem:[#allocation8 + $0x1c0] sm:$0xff]  ;;  %v592_v56 = vld [vmem:[#allocation8 + $0x1c8] sm:$0xff] }
  0x7f   :  { %1192 = vmatpush1.bf16.msra.mxu0 %v1191_v33  ;;  %v539_v33 = vld [vmem:[#allocation8 + $0x20] sm:$0xff]  ;;  %v1285_v57 = vpack.c.bf16 %v592_v56, %v591_v54  ;;  %v576_v62 = vld [vmem:[#allocation8 + $0x148] sm:$0xff]  ;;  %v562_v2 = vld [vmem:[#allocation8 + $0xd8] sm:$0xff] }
  0x80   :  { %1224 = vmatpush1.bf16.msra.mxu1 %v1223_v34  ;;  %1194 = vmatprep.subr.bf16.mxu0 %v1193_v35  ;;  %v540_v34 = vld [vmem:[#allocation8 + $0x28] sm:$0xff]  ;;  %v571_v35 = vld [vmem:[#allocation8 + $0x120] sm:$0xff]  ;;  %v593_v3 = vld [vmem:[#allocation8 + $0x1d0] sm:$0xff] }
  0x81   :  { %1226 = vmatprep.subr.bf16.mxu1 %v1225_v39  ;;  %v558_v39 = vld [vmem:[#allocation8 + $0xb8] sm:$0xff]  ;;  %v1247_v42 = vpack.c.bf16 %v540_v34, %v539_v33  ;;  %v545_v6 = vld [vmem:[#allocation8 + $0x50] sm:$0xff]  ;;  %v564_v14 = vld [vmem:[#allocation8 + $0xe8] sm:$0xff] }
  0x82   :  { %v1249_v43 = vpack.c.bf16 %v558_v39, %v557_v38  ;;  %v594_v5 = vld [vmem:[#allocation8 + $0x1d8] sm:$0xff]  ;;  %v577_v10 = vld [vmem:[#allocation8 + $0x150] sm:$0xff]  ;;  %v595_v15 = vld [vmem:[#allocation8 + $0x1e0] sm:$0xff] }
  0x83   :  { %1196 = vmatpush1.bf16.msra.mxu0 %v1195_v45  ;;  %v542_v45 = vld [vmem:[#allocation8 + $0x38] sm:$0xff]  ;;  %v596_v17 = vld [vmem:[#allocation8 + $0x1e8] sm:$0xff]  ;;  %v547_v18 = vld [vmem:[#allocation8 + $0x60] sm:$0xff] }
  0x84   :  { %1228 = vmatpush1.bf16.msra.mxu1 %v1227_v46  ;;  %1198 = vmatprep.subr.bf16.mxu0 %v1197_v47  ;;  %v1281_v46 = vpack.c.bf16 %v590_v41, %v589_v40  ;;  %v573_v47 = vld [vmem:[#allocation8 + $0x130] sm:$0xff]  ;;  %v1251_v50 = vpack.c.bf16 %v542_v45, %v541_v44  ;;  %v578_v11 = vld [vmem:[#allocation8 + $0x158] sm:$0xff]  ;;  %v579_v22 = vld [vmem:[#allocation8 + $0x160] sm:$0xff] }
  0x85   :  { %1230 = vmatprep.subr.bf16.mxu1 %v1229_v52  ;;  %v1283_v51 = vpack.c.bf16 %v574_v49, %v573_v47  ;;  %v559_v52 = vld [vmem:[#allocation8 + $0xc0] sm:$0xff]  ;;  %v1291_v12 = vpack.c.bf16 %v578_v11, %v577_v10  ;;  %v580_v0 = vld [vmem:[#allocation8 + $0x168] sm:$0xff]  ;;  %v565_v23 = vld [vmem:[#allocation8 + $0xf0] sm:$0xff] }
  0x86   :  { %v1253_v55 = vpack.c.bf16 %v560_v53, %v559_v52  ;;  %v566_v25 = vld [vmem:[#allocation8 + $0xf8] sm:$0xff]  ;;  %v597_v26 = vld [vmem:[#allocation8 + $0x1f0] sm:$0xff]  ;;  %v647_v38 = vld [vmem:[#allocation8 + $0x380] sm:$0xff] }
  0x87   :  { %1200 = vmatpush1.bf16.msra.mxu0 %v1199_v58  ;;  %v543_v58 = vld [vmem:[#allocation8 + $0x40] sm:$0xff]  ;;  %v598_v27 = vld [vmem:[#allocation8 + $0x1f8] sm:$0xff]  ;;  %v1265_v28 = vpack.c.bf16 %v566_v25, %v565_v23  ;;  %v648_v40 = vld [vmem:[#allocation8 + $0x388] sm:$0xff] }
  0x88   :  { %1232 = vmatpush1.bf16.msra.mxu1 %v1231_v59  ;;  %1202 = vmatprep.subr.bf16.mxu0 %v1201_v60  ;;  %v544_v59 = vld [vmem:[#allocation8 + $0x48] sm:$0xff]  ;;  %v575_v60 = vld [vmem:[#allocation8 + $0x140] sm:$0xff]  ;;  %v1297_v29 = vpack.c.bf16 %v598_v27, %v597_v26  ;;  %v582_v34 = vld [vmem:[#allocation8 + $0x178] sm:$0xff]  ;;  %v1333_v41 = vpack.c.bf16 %v648_v40, %v647_v38 }
  0x89   :  { %1234 = vmatprep.subr.bf16.mxu1 %v1233_v1  ;;  %v1255_v61 = vpack.c.bf16 %v544_v59, %v543_v58  ;;  %v1287_v63 = vpack.c.bf16 %v576_v62, %v575_v60  ;;  %v561_v1 = vld [vmem:[#allocation8 + $0xd0] sm:$0xff]  ;;  %v1610_v44 = vld [vmem:[#allocation7] sm:$0xff]  ;;  %v600_v62 = vld [vmem:[#allocation8 + $0x208] sm:$0xff] }
  0x8a   :  { %v1257_v4 = vpack.c.bf16 %v562_v2, %v561_v1  ;;  %v632_v1 = vld [vmem:[#allocation8 + $0x308] sm:$0xff]  ;;  %v617_v2 = vld [vmem:[#allocation8 + $0x290] sm:$0xff]  ;;  %v635_v26 = vld [vmem:[#allocation8 + $0x320] sm:$0xff] }
  0x8b   :  { %1204 = vmatpush1.bf16.msra.mxu0 %v1203_v7  ;;  %v546_v7 = vld [vmem:[#allocation8 + $0x58] sm:$0xff]  ;;  %v604_v25 = vld [vmem:[#allocation8 + $0x228] sm:$0xff]  ;;  %v637_v38 = vld [vmem:[#allocation8 + $0x330] sm:$0xff] }
  0x8c   :  { %1236 = vmatpush1.bf16.msra.mxu1 %v1235_v8  ;;  %1238 = vmatprep.subr.bf16.mxu0 %v1237_v9  ;;  %v1289_v8 = vpack.c.bf16 %v594_v5, %v593_v3  ;;  %v1259_v9 = vpack.c.bf16 %v546_v7, %v545_v6  ;;  %v618_v3 = vld [vmem:[#allocation8 + $0x298] sm:$0xff]  ;;  %v649_v5 = vld [vmem:[#allocation8 + $0x390] sm:$0xff] }
  0x8d   :  { %1270 = vmatprep.subr.bf16.mxu1 %v1269_v13  ;;  %v563_v13 = vld [vmem:[#allocation8 + $0xe0] sm:$0xff]  ;;  %v650_v6 = vld [vmem:[#allocation8 + $0x398] sm:$0xff]  ;;  %v1305_v11 = vpack.c.bf16 %v618_v3, %v617_v2 }
  0x8e   :  { %450 = vmatmul.mubr.f32.vlgmr.msra.gmra.mrb[2].mxu0 %v1599_v48  ;;  %v1261_v16 = vpack.c.bf16 %v564_v14, %v563_v13  ;;  %v602_v13 = vld [vmem:[#allocation8 + $0x218] sm:$0xff]  ;;  %v633_v14 = vld [vmem:[#allocation8 + $0x310] sm:$0xff] }
  0x8f   :  { %521 = vmatmul.mubr.f32.vlgmr.msra.gmra.mrb[2].mxu1 %v1599_v48  ;;  %1240 = vmatpush3.bf16.msra.mxu0 %v1239_v19  ;;  %v1279_v48 = vpack.c.bf16 %v572_v37, %v571_v35  ;;  %v548_v19 = vld [vmem:[#allocation8 + $0x68] sm:$0xff]  ;;  %v638_v40 = vld [vmem:[#allocation8 + $0x338] sm:$0xff] }
  0x90   :  { %1272 = vmatpush3.bf16.msra.mxu1 %v1271_v20  ;;  %1242 = vmatprep.subr.bf16.mxu0 %v1241_v21  ;;  %v1293_v20 = vpack.c.bf16 %v596_v17, %v595_v15  ;;  %v1263_v21 = vpack.c.bf16 %v548_v19, %v547_v18  ;;  %v616_v37 = vld [vmem:[#allocation8 + $0x288] sm:$0xff]  ;;  %v634_v17 = vld [vmem:[#allocation8 + $0x318] sm:$0xff]  ;;  %v619_v18 = vld [vmem:[#allocation8 + $0x2a0] sm:$0xff] }
  0x91   :  { %1274 = vmatprep.subr.bf16.mxu1 %v1273_v24  ;;  %v1295_v24 = vpack.c.bf16 %v580_v0, %v579_v22  ;;  %v620_v19 = vld [vmem:[#allocation8 + $0x2a8] sm:$0xff]  ;;  %v1339_v0 = vpack.c.bf16 %v634_v17, %v633_v14  ;;  %v659_v17 = vld [vmem:[#allocation8 + $0x3e0] sm:$0xff] }
  0x92   :  { %v1309_v23 = vpack.c.bf16 %v620_v19, %v619_v18  ;;  %v660_v18 = vld [vmem:[#allocation8 + $0x3e8] sm:$0xff] }
  0x93   :  { %1244 = vmatpush3.bf16.msra.mxu0 %v1243_v30  ;;  %v549_v30 = vld [vmem:[#allocation8 + $0x70] sm:$0xff] }
  0x94   :  { %1276 = vmatpush3.bf16.msra.mxu1 %v1275_v31  ;;  %1246 = vmatprep.subr.bf16.mxu0 %v1245_v32  ;;  %v550_v31 = vld [vmem:[#allocation8 + $0x78] sm:$0xff]  ;;  %v581_v32 = vld [vmem:[#allocation8 + $0x170] sm:$0xff] }
  0x95   :  { %1278 = vmatprep.subr.bf16.mxu1 %v1277_v36  ;;  %v1267_v33 = vpack.c.bf16 %v550_v31, %v549_v30  ;;  %v1299_v35 = vpack.c.bf16 %v582_v34, %v581_v32  ;;  %v615_v36 = vld [vmem:[#allocation8 + $0x280] sm:$0xff]  ;;  %v622_v30 = vld [vmem:[#allocation8 + $0x2b8] sm:$0xff]  ;;  %v653_v31 = vld [vmem:[#allocation8 + $0x3b0] sm:$0xff] }
  0x96   :  { %v1301_v39 = vpack.c.bf16 %v616_v37, %v615_v36  ;;  %v654_v32 = vld [vmem:[#allocation8 + $0x3b8] sm:$0xff]  ;;  %v605_v36 = vld [vmem:[#allocation8 + $0x230] sm:$0xff] }
  0x97   :  { %1248 = vmatpush3.bf16.msra.mxu0 %v1247_v42  ;;  %v203_v42 = vlaneseq  ;;  %v606_v37 = vld [vmem:[#allocation8 + $0x238] sm:$0xff] }
  0x98   :  { %1280 = vmatpush3.bf16.msra.mxu1 %v1279_v48  ;;  %1250 = vmatprep.subr.bf16.mxu0 %v1249_v43 }
  0x99   :  { %1282 = vmatprep.subr.bf16.mxu1 %v1281_v46  ;;  %v1607_v48 = vshrl.u32 %v203_v42, 7  ;;  %v624_v42 = vld [vmem:[#allocation8 + $0x2c8] sm:$0xff] }
  0x9b   :  { %1252 = vmatpush3.bf16.msra.mxu0 %v1251_v50  ;;  %v205_v43 = vsub.s32 0, %v1607_v48  ;;  %v213_v45 = vsub.s32 2, %v1607_v48  ;;  %v209_v46 = vsub.s32 1, %v1607_v48  ;;  %v217_v47 = vsub.s32 3, %v1607_v48 }
  0x9c   :  { %1284 = vmatpush3.bf16.msra.mxu1 %v1283_v51  ;;  %1254 = vmatprep.subr.bf16.mxu0 %v1253_v55 }
  0x9d   :  { %1286 = vmatprep.subr.bf16.mxu1 %v1285_v57  ;;  %v206_v49 = vrot.slane %v1610_v44, %v205_v43  ;;  %v214_v50 = vrot.slane %v1610_v44, %v213_v45  ;;  %v210_v51 = vrot.slane %v1610_v44, %v209_v46  ;;  %v218_v52 = vrot.slane %v1610_v44, %v217_v47  ;;  %v655_v45 = vld [vmem:[#allocation8 + $0x3c0] sm:$0xff]  ;;  %v656_v46 = vld [vmem:[#allocation8 + $0x3c8] sm:$0xff] }
  0x9e   :  { %v221_v43 = vsub.s32 4, %v1607_v48  ;;  %v1315_v47 = vpack.c.bf16 %v606_v37, %v605_v36  ;;  %v613_v36 = vld [vmem:[#allocation8 + $0x270] sm:$0xff]  ;;  %v614_v37 = vld [vmem:[#allocation8 + $0x278] sm:$0xff] }
  0x9f   :  { %1256 = vmatpush3.bf16.msra.mxu0 %v1255_v61  ;;  %v599_v61 = vld [vmem:[#allocation8 + $0x200] sm:$0xff] }
  0xa0   :  { %1288 = vmatpush3.bf16.msra.mxu1 %v1287_v63  ;;  %1258 = vmatprep.subr.bf16.mxu0 %v1257_v4  ;;  %v631_v63 = vld [vmem:[#allocation8 + $0x300] sm:$0xff] }
  0xa1   :  { %1290 = vmatprep.subr.bf16.mxu1 %v1289_v8  ;;  %v1303_v8 = vpack.c.bf16 %v600_v62, %v599_v61  ;;  %v1335_v10 = vpack.c.bf16 %v632_v1, %v631_v63  ;;  %v222_v61 = vrot.slane %v1610_v44, %v221_v43  ;;  %v657_v62 = vld [vmem:[#allocation8 + $0x3d0] sm:$0xff]  ;;  %v658_v63 = vld [vmem:[#allocation8 + $0x3d8] sm:$0xff] }
  0xa3   :  { %1260 = vmatpush3.bf16.msra.mxu0 %v1259_v9 }
  0xa4   :  { %1292 = vmatpush3.bf16.msra.mxu1 %v1291_v12  ;;  %1262 = vmatprep.subr.bf16.mxu0 %v1261_v16  ;;  %v601_v12 = vld [vmem:[#allocation8 + $0x210] sm:$0xff]  ;;  %v1337_v16 = vpack.c.bf16 %v650_v6, %v649_v5 }
  0xa5   :  { %1294 = vmatprep.subr.bf16.mxu1 %v1293_v20  ;;  %v651_v20 = vld [vmem:[#allocation8 + $0x3a0] sm:$0xff]  ;;  %v1307_v22 = vpack.c.bf16 %v602_v13, %v601_v12  ;;  %v609_v6 = vld [vmem:[#allocation8 + $0x250] sm:$0xff]  ;;  %v628_v13 = vld [vmem:[#allocation8 + $0x2e8] sm:$0xff] }
  0xa6   :  { %v627_v12 = vld [vmem:[#allocation8 + $0x2e0] sm:$0xff] }
  0xa7   :  { %1264 = vmatpush3.bf16.msra.mxu0 %v1263_v21  ;;  %v652_v21 = vld [vmem:[#allocation8 + $0x3a8] sm:$0xff] }
  0xa8   :  { %1296 = vmatpush3.bf16.msra.mxu1 %v1295_v24  ;;  %1266 = vmatprep.subr.bf16.mxu0 %v1265_v28  ;;  %v603_v24 = vld [vmem:[#allocation8 + $0x220] sm:$0xff]  ;;  %v1341_v27 = vpack.c.bf16 %v652_v21, %v651_v20  ;;  %v636_v28 = vld [vmem:[#allocation8 + $0x328] sm:$0xff] }
  0xa9   :  { %1298 = vmatprep.subr.bf16.mxu1 %v1297_v29  ;;  %v621_v29 = vld [vmem:[#allocation8 + $0x2b0] sm:$0xff]  ;;  %v1343_v34 = vpack.c.bf16 %v636_v28, %v635_v26  ;;  %v643_v26 = vld [vmem:[#allocation8 + $0x360] sm:$0xff]  ;;  %v644_v28 = vld [vmem:[#allocation8 + $0x368] sm:$0xff] }
  0xab   :  { %1268 = vmatpush3.bf16.msra.mxu0 %v1267_v33  ;;  %v1311_v33 = vpack.c.bf16 %v604_v25, %v603_v24  ;;  %v611_v24 = vld [vmem:[#allocation8 + $0x260] sm:$0xff]  ;;  %v612_v25 = vld [vmem:[#allocation8 + $0x268] sm:$0xff] }
  0xac   :  { %1300 = vmatpush3.bf16.msra.mxu1 %v1299_v35  ;;  %1302 = vmatprep.subr.bf16.mxu0 %v1301_v39  ;;  %v1313_v35 = vpack.c.bf16 %v622_v30, %v621_v29  ;;  %v1345_v39 = vpack.c.bf16 %v654_v32, %v653_v31  ;;  %v629_v29 = vld [vmem:[#allocation8 + $0x2f0] sm:$0xff]  ;;  %v630_v30 = vld [vmem:[#allocation8 + $0x2f8] sm:$0xff] }
  0xad   :  { %1334 = vmatprep.subr.bf16.mxu1 %v1333_v41  ;;  %v623_v41 = vld [vmem:[#allocation8 + $0x2c0] sm:$0xff]  ;;  %v661_v31 = vld [vmem:[#allocation8 + $0x3f0] sm:$0xff]  ;;  %v662_v32 = vld [vmem:[#allocation8 + $0x3f8] sm:$0xff] }
 0x141   :  { %v309_v53 = vpop.f32.mrb[0].mxu0 }
 0x142   :  { %v310_v54 = vadd.f32 %v309_v53, %v206_v49  ;;  %v380_v55 = vpop.f32.mrb[0].mxu1  ;;  %v311_v56 = vpop.f32.mrb[1].mxu0  ;;  %v229_v49 = vsub.s32 6, %v1607_v48  ;;  %v233_v53 = vsub.s32 7, %v1607_v48 }
 0x143   :  { %v381_v57 = vadd.f32 %v380_v55, %v214_v50  ;;  %v312_v58 = vadd.f32 %v311_v56, %v210_v51  ;;  %v382_v59 = vpop.f32.mrb[1].mxu1  ;;  %v225_v50 = vsub.s32 5, %v1607_v48  ;;  %v1347_v51 = vpack.c.bf16 %v638_v40, %v637_v38  ;;  %v608_v55 = vld [vmem:[#allocation8 + $0x248] sm:$0xff]  ;;  %v639_v56 = vld [vmem:[#allocation8 + $0x340] sm:$0xff]  ;;  %v646_v40 = vld [vmem:[#allocation8 + $0x378] sm:$0xff] }
 0x144   :  { %1375 = vtanh.f32 %v310_v54  ;;  %v383_v60 = vadd.f32 %v382_v59, %v218_v52  ;;  %v1317_v52 = vpack.c.bf16 %v624_v42, %v623_v41  ;;  %v607_v54 = vld [vmem:[#allocation8 + $0x240] sm:$0xff]  ;;  %v625_v59 = vld [vmem:[#allocation8 + $0x2d0] sm:$0xff]  ;;  %v230_v1 = vrot.slane %v1610_v44, %v229_v49 }
 0x145   :  { %1377 = vtanh.f32 %v381_v57  ;;  %v1349_v57 = vpack.c.bf16 %v656_v46, %v655_v45  ;;  %v226_v2 = vrot.slane %v1610_v44, %v225_v50  ;;  %v1319_v3 = vpack.c.bf16 %v608_v55, %v607_v54 }
 0x146   :  { %1379 = vtanh.f32 %v312_v58  ;;  %v640_v58 = vld [vmem:[#allocation8 + $0x348] sm:$0xff]  ;;  %v234_v48 = vrot.slane %v1610_v44, %v233_v53  ;;  %v1361_v38 = vpack.c.bf16 %v662_v32, %v661_v31  ;;  %v1331_v41 = vpack.c.bf16 %v614_v37, %v613_v36 }
 0x147   :  { %1381 = vtanh.f32 %v383_v60  ;;  %v626_v60 = vld [vmem:[#allocation8 + $0x2d8] sm:$0xff] }
 0x148   :  { %v1321_v5 = vpack.c.bf16 %v626_v60, %v625_v59 }
 0x14e   :  { %v1376_v4 = vpop.eup %1375 }
 0x14f   :  { %v1378_v7 = vpop.eup %1377 }
 0x150   :  { %v1380_v9 = vpop.eup %1379 }
 0x151   :  { %v1382_v15 = vpop.eup %1381  ;;  %734 = vmatprep.mubr.f32.mxu0 %v1380_v9 }
 0x152   :  { %804 = vmatprep.mubr.f32.mxu1 %v1382_v15  ;;  %735 = vmatmul.mubr.f32.vlgmr.msra.gmra.mrb[4].mxu0 %v1376_v4  ;;  %v1351_v4 = vpack.c.bf16 %v640_v58, %v639_v56 }
 0x153   :  { %805 = vmatmul.mubr.f32.vlgmr.msra.gmra.mrb[4].mxu1 %v1378_v7  ;;  %1304 = vmatpush3.bf16.msra.mxu0 %v1303_v8  ;;  %v610_v7 = vld [vmem:[#allocation8 + $0x258] sm:$0xff]  ;;  %v641_v8 = vld [vmem:[#allocation8 + $0x350] sm:$0xff] }
 0x154   :  { %1336 = vmatpush3.bf16.msra.mxu1 %v1335_v10  ;;  %1306 = vmatprep.subr.bf16.mxu0 %v1305_v11  ;;  %v1353_v10 = vpack.c.bf16 %v658_v63, %v657_v62  ;;  %v642_v11 = vld [vmem:[#allocation8 + $0x358] sm:$0xff]  ;;  %v1323_v44 = vpack.c.bf16 %v610_v7, %v609_v6 }
 0x155   :  { %1338 = vmatprep.subr.bf16.mxu1 %v1337_v16 }
 0x157   :  { %1308 = vmatpush3.bf16.msra.mxu0 %v1307_v22 }
 0x158   :  { %1340 = vmatpush3.bf16.msra.mxu1 %v1339_v0  ;;  %1310 = vmatprep.subr.bf16.mxu0 %v1309_v23  ;;  %v1355_v0 = vpack.c.bf16 %v642_v11, %v641_v8  ;;  %v1325_v23 = vpack.c.bf16 %v628_v13, %v627_v12 }
 0x159   :  { %1342 = vmatprep.subr.bf16.mxu1 %v1341_v27  ;;  %v1357_v27 = vpack.c.bf16 %v660_v18, %v659_v17 }
 0x15b   :  { %1312 = vmatpush3.bf16.msra.mxu0 %v1311_v33  ;;  %v1327_v33 = vpack.c.bf16 %v612_v25, %v611_v24 }
 0x15c   :  { %1344 = vmatpush3.bf16.msra.mxu1 %v1343_v34  ;;  %1314 = vmatprep.subr.bf16.mxu0 %v1313_v35  ;;  %v1359_v34 = vpack.c.bf16 %v644_v28, %v643_v26  ;;  %v1329_v35 = vpack.c.bf16 %v630_v30, %v629_v29 }
 0x15d   :  { %1346 = vmatprep.subr.bf16.mxu1 %v1345_v39  ;;  %v645_v39 = vld [vmem:[#allocation8 + $0x370] sm:$0xff] }
 0x15e   :  { %v1363_v42 = vpack.c.bf16 %v646_v40, %v645_v39 }
 0x15f   :  { %1316 = vmatpush3.bf16.msra.mxu0 %v1315_v47 }
 0x160   :  { %1348 = vmatpush3.bf16.msra.mxu1 %v1347_v51  ;;  %1318 = vmatprep.subr.bf16.mxu0 %v1317_v52  ;;  %v968_v51 = vld [vmem:[%s1646_s4] ss:$0 sm:$0xff] }
 0x161   :  { %v451_v9 = vpop.f32.mrb[2].mxu0  ;;  %1350 = vmatprep.subr.bf16.mxu1 %v1349_v57 }
 0x162   :  { %v452_v14 = vadd.f32 %v451_v9, %v222_v61  ;;  %v522_v15 = vpop.f32.mrb[2].mxu1  ;;  %v453_v16 = vpop.f32.mrb[3].mxu0 }
 0x163   :  { %v523_v19 = vadd.f32 %v522_v15, %v230_v1  ;;  %v454_v20 = vadd.f32 %v453_v16, %v226_v2  ;;  %v524_v21 = vpop.f32.mrb[3].mxu1  ;;  %1320 = vmatpush3.bf16.msra.mxu0 %v1319_v3 }
 0x164   :  { %1383 = vtanh.f32 %v452_v14  ;;  %v525_v22 = vadd.f32 %v524_v21, %v234_v48  ;;  %1352 = vmatpush3.bf16.msra.mxu1 %v1351_v4  ;;  %1322 = vmatprep.subr.bf16.mxu0 %v1321_v5 }
 0x165   :  { %1385 = vtanh.f32 %v523_v19  ;;  %1354 = vmatprep.subr.bf16.mxu1 %v1353_v10 }
 0x166   :  { %1387 = vtanh.f32 %v454_v20 }
 0x167   :  { %1389 = vtanh.f32 %v525_v22  ;;  %1324 = vmatpush3.bf16.msra.mxu0 %v1323_v44 }
 0x168   :  { %1356 = vmatpush3.bf16.msra.mxu1 %v1355_v0  ;;  %1326 = vmatprep.subr.bf16.mxu0 %v1325_v23 }
 0x169   :  { %1358 = vmatprep.subr.bf16.mxu1 %v1357_v27 }
 0x16b   :  { %1328 = vmatpush3.bf16.msra.mxu0 %v1327_v33 }
 0x16c   :  { %1360 = vmatpush3.bf16.msra.mxu1 %v1359_v34  ;;  %1330 = vmatprep.subr.bf16.mxu0 %v1329_v35 }
 0x16d   :  { %1362 = vmatprep.subr.bf16.mxu1 %v1361_v38 }
 0x16e   :  { %v1384_v43 = vpop.eup %1383 }
 0x16f   :  { %v1386_v45 = vpop.eup %1385  ;;  %1332 = vmatpush3.bf16.msra.mxu0 %v1331_v41 }
 0x170   :  { %v1388_v46 = vpop.eup %1387  ;;  %1364 = vmatpush3.bf16.msra.mxu1 %v1363_v42 }
 0x171   :  { %v1390_v47 = vpop.eup %1389  ;;  %874 = vmatprep.mubr.f32.mxu0 %v1388_v46 }
 0x172   :  { %944 = vmatprep.mubr.f32.mxu1 %v1390_v47  ;;  %875 = vmatmul.mubr.f32.vlgmr.msra.gmra.mrb[6].mxu0 %v1384_v43 }
 0x173   :  { %945 = vmatmul.mubr.f32.vlgmr.msra.gmra.mrb[6].mxu1 %v1386_v45 }
 0x225   :  { %v1001_v49 = vpop.f32.mrb[4].mxu0 }
 0x226   :  { %v1036_v50 = vpop.f32.mrb[4].mxu1  ;;  %v1002_v52 = vpop.f32.mrb[5].mxu0 }
 0x227   :  { %v1003_v53 = vadd.f32 %v1002_v52, %v1001_v49  ;;  %v1037_v54 = vpop.f32.mrb[5].mxu1 }
 0x228   :  { %v1038_v55 = vadd.f32 %v1037_v54, %v1036_v50 }
 0x229   :  { %v737_v56 = vadd.f32 %v1003_v53, %v968_v51 }
 0x22b   :  { %v807_v57 = vadd.f32 %v1038_v55, %v737_v56 }
 0x245   :  { %v1071_v58 = vpop.f32.mrb[6].mxu0 }
 0x246   :  { %v1106_v59 = vpop.f32.mrb[6].mxu1  ;;  %v1072_v60 = vpop.f32.mrb[7].mxu0 }
 0x247   :  { %v1073_v61 = vadd.f32 %v1072_v60, %v1071_v58  ;;  %v1107_v62 = vpop.f32.mrb[7].mxu1 }
 0x248   :  { %v1108_v63 = vadd.f32 %v1107_v62, %v1106_v59 }
 0x249   :  { %v877_v1 = vadd.f32 %v1073_v61, %v807_v57 }
 0x24b   :  { %v947_v2 = vadd.f32 %v1108_v63, %v877_v1 }
 0x24d   :  { %950 = vst [vmem:[#allocation10] sm:$0xff] %v947_v2 }
 0x24e   :  { %1490 = shalt.err (!%p1487_p8)
}
 0x24f   :  { %s1491_s21 = scalar_lea.hbm %s1647_s5, 128 }
 0x250   :  { %p1492_p9 = scmp.ne.s32.totalorder %s1647_s5, %s1491_s21  ;;  %p1495_p10 = scmp.lt.u32.totalorder %s1491_s21, %s1647_s5 }
 0x252   :  { %p1497_p11 = pnand %p1495_p10, %p1492_p9 }
 0x254   :  { %1500 = shalt.err (!%p1497_p11)
}
 0x255   :  { %960 = dma.vmem_to_hbm [thread:$0]  %s958_s18, 128, %s1647_s5, [#allocation4]  }
 0x256   :  { %1507 = dma.done.wait [#allocation4], 128  }
 0x257   :  { %1508 = vsyncadd [#allocation4], 4294967168 }
 0x258   :  { %964 = vsyncpa [#allocation3], 1 }
 0x259   :  { %965 = vsyncpa [#allocation6], 1 }
 0x25a   :  { %966 = vsyncpa [#allocation9], 1 }
 0x25b   :  { %967 = vsyncpa [#allocation4], 1 }

</bundles_post_ra>
